<compile_context>
chip_gen: v6e
topology: v6e:2x2x1
jax: 0.10.0
libtpu: 0.0.40
codegen_flags: <defaults>
</compile_context>

<pallas_src>
import functools

import jax
import jax.numpy as jnp
from jax import lax
from jax.experimental import pallas as pl
from jax.experimental.pallas import tpu as pltpu


def _round_up(a, b):
    return (a + b - 1) // b * b


def conv_bn_relu_pool_kernel(w_ref, p_ref, shift_ref, o_ref):
    """One column tile: conv-as-matmul over 4 pool positions (running max) + shift + ReLU."""
    # Four sub-matmuls, one per 2x2 pool-window position, with a running max: the
    # pre-pool intermediate never exceeds one [Co, TCOL] f32 tile (2x smaller peak live
    # data than materializing the full pre-pool slab).
    m = jnp.dot(w_ref[...], p_ref[0], preferred_element_type=jnp.float32)
    for j in range(1, 4):
        m = jnp.maximum(
            m, jnp.dot(w_ref[...], p_ref[j], preferred_element_type=jnp.float32))
    # BN scale (and conv bias / BN mean) are folded into the weights / shift in the
    # wrapper.  The per-channel shift commutes with max and ReLU is monotone, so both are
    # applied once on the pooled tile (4x less VPU work than pre-pool).
    o_ref[...] = jnp.maximum(m + shift_ref[...], 0.0).astype(o_ref.dtype)


@functools.partial(jax.jit, static_argnames=("stride", "padding", "eps"))
def conv_block_forward(x, w, b, gamma, beta, running_mean, running_var,
                       *, stride=1, padding=1, eps=1e-5):
    """maxpool2x2(relu(bn(conv2d(x)))) — x:[N,Ci,H,W], w:[Co,Ci,Kh,Kw] -> [N,Co,Ho//2,Wo//2]."""
    # TODO(synk): training-mode BatchNorm (batch statistics) not implemented; eval-mode
    # running stats are folded into a per-channel scale/shift.
    N, Ci, H, W = x.shape
    Co, _, Kh, Kw = w.shape
    Ho = (H + 2 * padding - Kh) // stride + 1
    Wo = (W + 2 * padding - Kw) // stride + 1
    Hp, Wp = Ho // 2, Wo // 2                       # after 2x2 pool (floor, as nn.MaxPool2d)
    K = Ci * Kh * Kw
    M = N * Hp * Wp                                 # pooled output pixels (lane dimension)

    # ---- im2col in the wrapper: one stack + one transpose, columns laid out as
    # [pool_window(4), K, M] so each column tile is a rectangular, auto-pipelinable block.
    # TODO(synk): for large Ci move im2col into the kernel (x_pad left in HBM via
    # memory_space=pl.ANY + a (kh,kw) reduction grid axis) to avoid the Kh*Kw-fold HBM
    # duplication of the input.
    x_pad = jnp.pad(x, ((0, 0), (0, 0), (padding, padding), (padding, padding)))
    cols = []
    for kh in range(Kh):
        for kw in range(Kw):
            sl = x_pad[:, :, kh:kh + stride * Ho:stride, kw:kw + stride * Wo:stride]
            cols.append(sl[:, :, :2 * Hp, :2 * Wp])           # [N, Ci, 2Hp, 2Wp]
    patches = jnp.stack(cols, axis=0)                          # [KK, N, Ci, 2Hp, 2Wp]
    patches = patches.reshape(Kh * Kw, N, Ci, Hp, 2, Wp, 2)
    patches = patches.transpose(4, 6, 2, 0, 1, 3, 5)           # [dh, dw, Ci, KK, N, Hp, Wp]
    patches = patches.reshape(4, K, M)

    # ---- fold conv bias + eval-mode BN: scale goes into the weights, shift stays.
    inv_std = lax.rsqrt(running_var + eps)
    scale = gamma * inv_std                                    # [Co]
    w_mat = (w.reshape(Co, K) * scale[:, None]).astype(jnp.bfloat16)
    shift = (beta + (b - running_mean) * scale).reshape(Co, 1).astype(jnp.float32)
    patches = patches.astype(jnp.bfloat16)                     # halve bytes of the big stream

    # ---- column tile: 128-aligned (v5e MXU), capped at 2048 (multiple of 256 for
    # v6e/v7x), sized so a triple-buffered bf16 patches block stays under ~10 MiB.
    bytes_per_col = 4 * K * 2                                  # bf16, 4 pool positions
    tcol = (10 * 1024 * 1024) // (3 * bytes_per_col)
    tcol = max(128, min(2048, tcol) // 128 * 128)
    tcol = min(tcol, _round_up(M, 128))
    M_pad = _round_up(M, tcol)
    if M_pad != M:
        patches = jnp.pad(patches, ((0, 0), (0, 0), (0, M_pad - M)))
    n_tiles = M_pad // tcol

    patches_spec = pl.BlockSpec((4, K, tcol), lambda i: (0, 0, i))
    if n_tiles >= 3:
        # Memory-bound at small Co: deeper buffering hides HBM latency on the big stream.
        patches_spec = pl.BlockSpec((4, K, tcol), lambda i: (0, 0, i),
                                    pipeline_mode=pl.Buffered(3))

    out = pl.pallas_call(
        conv_bn_relu_pool_kernel,
        out_shape=jax.ShapeDtypeStruct((Co, M_pad), x.dtype),
        grid=(n_tiles,),
        in_specs=[
            pl.BlockSpec((Co, K), lambda i: (0, 0)),           # weights: resident across steps
            patches_spec,                                      # streamed column tiles
            pl.BlockSpec((Co, 1), lambda i: (0, 0)),           # per-channel shift
        ],
        out_specs=pl.BlockSpec((Co, tcol), lambda i: (0, i)),  # lane-dense output tiles
        compiler_params=pltpu.CompilerParams(
            dimension_semantics=("parallel",),                 # shard tiles across TCs (v7x)
            vmem_limit_bytes=48 * 1024 * 1024,                 # fits v7x 64 MiB, > v5e default
        ),
    )(w_mat, patches, shift)

    # [Co, M] (lane-dense kernel layout) -> [N, Co, Hp, Wp] (PyTorch layout).  Kept only to
    # match the module contract; a fused downstream consumer should take [Co, N*Hp*Wp].
    out = out[:, :M]
    return out.reshape(Co, N, Hp, Wp).transpose(1, 0, 2, 3)


def reference_conv_block(x, w, b, gamma, beta, mean, var, *, stride, padding, eps):
    conv = lax.conv_general_dilated(
        x, w, window_strides=(stride, stride),
        padding=[(padding, padding), (padding, padding)],
        dimension_numbers=("NCHW", "OIHW", "NCHW"))
    conv = conv + b[None, :, None, None]
    bn = (conv - mean[None, :, None, None]) * lax.rsqrt(var[None, :, None, None] + eps)
    bn = bn * gamma[None, :, None, None] + beta[None, :, None, None]
    act = jnp.maximum(bn, 0.0)
    return lax.reduce_window(act, -jnp.inf, lax.max,
                             window_dimensions=(1, 1, 2, 2),
                             window_strides=(1, 1, 2, 2), padding="VALID")


if __name__ == "__main__":
    N, Ci, H, W = 2, 4, 16, 16
    Co, Kh, Kw = 8, 3, 3
    stride, padding, eps = 1, 1, 1e-5

    key = jax.random.PRNGKey(0)
    kx, kw_, kb, kg, kbe, km, kv = jax.random.split(key, 7)

    bound = 1.0 / jnp.sqrt(Ci * Kh * Kw)
    x = jax.random.normal(kx, (N, Ci, H, W), jnp.float32)
    w = jax.random.uniform(kw_, (Co, Ci, Kh, Kw), jnp.float32, -bound, bound)
    b = jax.random.uniform(kb, (Co,), jnp.float32, -bound, bound)
    gamma = jax.random.uniform(kg, (Co,), jnp.float32, 0.5, 1.5)
    beta = jax.random.uniform(kbe, (Co,), jnp.float32, -0.5, 0.5)
    running_mean = 0.1 * jax.random.normal(km, (Co,), jnp.float32)
    running_var = jax.random.uniform(kv, (Co,), jnp.float32, 0.5, 1.5)

    out = conv_block_forward(x, w, b, gamma, beta, running_mean, running_var,
                             stride=stride, padding=padding, eps=eps)
    out = jax.block_until_ready(out)

    ref = reference_conv_block(x, w, b, gamma, beta, running_mean, running_var,
                               stride=stride, padding=padding, eps=eps)
    assert out.shape == (N, Co, H // 2, W // 2), out.shape
    max_err = float(jnp.max(jnp.abs(out - ref)))
    # bf16 weight/patch streams with f32 MXU accumulation -> relaxed tolerance vs the
    # f32 reference (exact transforms otherwise: scale-fold, shift-after-pool, relu-after-pool).
    assert jnp.allclose(out, ref, atol=1e-1, rtol=1e-2), f"max abs err = {max_err}"
    print("KERNEL_OK")
</pallas_src>

<mosaic_0001>
module attributes {stable_mosaic.version = 11 : i64} {
  func.func @conv_bn_relu_pool_kernel(%arg0: i32, %arg1: memref<8x36xbf16, #tpu.memory_space<vmem>>, %arg2: memref<4x36x128xbf16, #tpu.memory_space<vmem>>, %arg3: memref<8x1xf32, #tpu.memory_space<vmem>>, %arg4: memref<8x128xf32, #tpu.memory_space<vmem>>) attributes {dimension_semantics = [#tpu.dimension_semantics<parallel>], iteration_bounds = array<i64: 1>, scalar_prefetch = 0 : i64, scratch_operands = 0 : i64, tpu.core_type = #tpu.core_type<tc>, window_params = [{pipeline_mode = #tpu.pipeline_mode<synchronous>, transform_indices = @transform_0, window_bounds = array<i64: 8, 36>}, {transform_indices = @transform_1, window_bounds = array<i64: 4, 36, 128>}, {pipeline_mode = #tpu.pipeline_mode<synchronous>, transform_indices = @transform_2, window_bounds = array<i64: 8, 1>}, {transform_indices = @transform_3, window_bounds = array<i64: 8, 128>}]} {
    %c0 = arith.constant 0 : index
    %c0_0 = arith.constant 0 : index
    %0 = vector.load %arg1[%c0, %c0_0] : memref<8x36xbf16, #tpu.memory_space<vmem>>, vector<8x36xbf16>
    %c0_1 = arith.constant 0 : index
    %c0_2 = arith.constant 0 : index
    %c0_3 = arith.constant 0 : index
    %1 = vector.load %arg2[%c0_1, %c0_2, %c0_3] : memref<4x36x128xbf16, #tpu.memory_space<vmem>>, vector<1x36x128xbf16>
    %2 = vector.shape_cast %1 : vector<1x36x128xbf16> to vector<36x128xbf16>
    %cst = arith.constant dense<0.000000e+00> : vector<8x128xf32>
    %3 = tpu.matmul %0, %2, %cst {dimension_numbers = #tpu.dot_dimension_numbers<[1], [0], [0], [1], [0, 0, 1, 1], [], []>} : vector<8x36xbf16>, vector<36x128xbf16>, vector<8x128xf32> -> vector<8x128xf32>
    %c0_4 = arith.constant 0 : index
    %c0_5 = arith.constant 0 : index
    %4 = vector.load %arg1[%c0_4, %c0_5] : memref<8x36xbf16, #tpu.memory_space<vmem>>, vector<8x36xbf16>
    %c1 = arith.constant 1 : index
    %c0_6 = arith.constant 0 : index
    %c0_7 = arith.constant 0 : index
    %5 = vector.load %arg2[%c1, %c0_6, %c0_7] : memref<4x36x128xbf16, #tpu.memory_space<vmem>>, vector<1x36x128xbf16>
    %6 = vector.shape_cast %5 : vector<1x36x128xbf16> to vector<36x128xbf16>
    %cst_8 = arith.constant dense<0.000000e+00> : vector<8x128xf32>
    %7 = tpu.matmul %4, %6, %cst_8 {dimension_numbers = #tpu.dot_dimension_numbers<[1], [0], [0], [1], [0, 0, 1, 1], [], []>} : vector<8x36xbf16>, vector<36x128xbf16>, vector<8x128xf32> -> vector<8x128xf32>
    %8 = arith.maximumf %3, %7 : vector<8x128xf32>
    %c0_9 = arith.constant 0 : index
    %c0_10 = arith.constant 0 : index
    %9 = vector.load %arg1[%c0_9, %c0_10] : memref<8x36xbf16, #tpu.memory_space<vmem>>, vector<8x36xbf16>
    %c2 = arith.constant 2 : index
    %c0_11 = arith.constant 0 : index
    %c0_12 = arith.constant 0 : index
    %10 = vector.load %arg2[%c2, %c0_11, %c0_12] : memref<4x36x128xbf16, #tpu.memory_space<vmem>>, vector<1x36x128xbf16>
    %11 = vector.shape_cast %10 : vector<1x36x128xbf16> to vector<36x128xbf16>
    %cst_13 = arith.constant dense<0.000000e+00> : vector<8x128xf32>
    %12 = tpu.matmul %9, %11, %cst_13 {dimension_numbers = #tpu.dot_dimension_numbers<[1], [0], [0], [1], [0, 0, 1, 1], [], []>} : vector<8x36xbf16>, vector<36x128xbf16>, vector<8x128xf32> -> vector<8x128xf32>
    %13 = arith.maximumf %8, %12 : vector<8x128xf32>
    %c0_14 = arith.constant 0 : index
    %c0_15 = arith.constant 0 : index
    %14 = vector.load %arg1[%c0_14, %c0_15] : memref<8x36xbf16, #tpu.memory_space<vmem>>, vector<8x36xbf16>
    %c3 = arith.constant 3 : index
    %c0_16 = arith.constant 0 : index
    %c0_17 = arith.constant 0 : index
    %15 = vector.load %arg2[%c3, %c0_16, %c0_17] : memref<4x36x128xbf16, #tpu.memory_space<vmem>>, vector<1x36x128xbf16>
    %16 = vector.shape_cast %15 : vector<1x36x128xbf16> to vector<36x128xbf16>
    %cst_18 = arith.constant dense<0.000000e+00> : vector<8x128xf32>
    %17 = tpu.matmul %14, %16, %cst_18 {dimension_numbers = #tpu.dot_dimension_numbers<[1], [0], [0], [1], [0, 0, 1, 1], [], []>} : vector<8x36xbf16>, vector<36x128xbf16>, vector<8x128xf32> -> vector<8x128xf32>
    %18 = arith.maximumf %13, %17 : vector<8x128xf32>
    %c0_19 = arith.constant 0 : index
    %c0_20 = arith.constant 0 : index
    %19 = vector.load %arg3[%c0_19, %c0_20] : memref<8x1xf32, #tpu.memory_space<vmem>>, vector<8x1xf32>
    %20 = vector.broadcast %19 : vector<8x1xf32> to vector<8x128xf32>
    %21 = arith.addf %18, %20 : vector<8x128xf32>
    %cst_21 = arith.constant 0.000000e+00 : f32
    %22 = vector.broadcast %cst_21 : f32 to vector<8x128xf32>
    %23 = arith.maximumf %21, %22 : vector<8x128xf32>
    %c0_22 = arith.constant 0 : index
    %c0_23 = arith.constant 0 : index
    %24 = vector.load %arg4[%c0_22, %c0_23] : memref<8x128xf32, #tpu.memory_space<vmem>>, vector<8x128xf32>
    tpu.vector_store %arg4[%c0_22, %c0_23], %23 {strides = array<i32>} : memref<8x128xf32, #tpu.memory_space<vmem>>, vector<8x128xf32>,
    return
  }
  func.func @transform_0(%arg0: i32) -> (i32, i32) {
    %c0_i32 = arith.constant 0 : i32
    %c0_i32_0 = arith.constant 0 : i32
    %c0_i32_1 = arith.constant 0 : i32
    return %c0_i32, %c0_i32_0 : i32, i32
  }
  func.func @transform_1(%arg0: i32) -> (i32, i32, i32) {
    %c0_i32 = arith.constant 0 : i32
    %c0_i32_0 = arith.constant 0 : i32
    %c0_i32_1 = arith.constant 0 : i32
    return %c0_i32, %c0_i32_0, %arg0 : i32, i32, i32
  }
  func.func @transform_2(%arg0: i32) -> (i32, i32) {
    %c0_i32 = arith.constant 0 : i32
    %c0_i32_0 = arith.constant 0 : i32
    %c0_i32_1 = arith.constant 0 : i32
    return %c0_i32, %c0_i32_0 : i32, i32
  }
  func.func @transform_3(%arg0: i32) -> (i32, i32) {
    %c0_i32 = arith.constant 0 : i32
    %c0_i32_0 = arith.constant 0 : i32
    return %c0_i32, %arg0 : i32, i32
  }
}

</mosaic_0001>

<bundles_post_ra>
// kernel: conv_block_forward.1
= control target key start
LH: loop header
LB: loop body
LE: loop exit
PB: predicated region body
PF: predicated region fallthrough
CT: control target
= control target key end

     0   :  { %vm40_vm0 = vcmask 1041408   ;;  %v395_v0 = vmov 0.0   ;;  %vm396_vm1 = vmmov 0   ;;  %vm36_vm2 = vcmask 293888   ;;  %s475_s1 = inlined_call_operand.vmem [shape: bf16[4,36,128], index: 1, kind: input, shape index: {}]   ;;  %s476_s0 = inlined_call_operand.vmem [shape: bf16[8,36], index: 0, kind: input, shape index: {}]   ;;  %s477_s2 = inlined_call_operand.vmem [shape: f32[8,1], index: 2, kind: input, shape index: {}]   ;;  %s478_s3 = inlined_call_operand.vmem [shape: f32[8,128], index: 3, kind: output, shape index: {}]  }
   0x1   :  { %339 = vmatprep.subr.bf16.mxu0 %v395_v0  ;;  %349 = vmatprep.subr.bf16.mxu1 %v395_v0  ;;  %v383_v1 = vld [vmem:[%s475_s1 + $0x10] ss:$0 sps:$4 sm:$0x33]   ;;  %v384_v2 = vld [vmem:[%s475_s1 + $0x24] ss:$0 sps:$4 sm:$0x33]  }
   0x2   :  { %345 = vmatprep.mubr.msk.bf16.mxu0 %vm396_vm1, %v395_v0  ;;  %355 = vmatprep.mubr.msk.bf16.mxu1 %vm396_vm1, %v395_v0  ;;  %v42_v3 = vsel %vm40_vm0, %v383_v1, 0  ;;  %v385_v4 = vld [vmem:[%s475_s1 + $0x8] sm:$0xff]   ;;  %v106_v5 = vsel %vm40_vm0, %v384_v2, 0  ;;  %v386_v6 = vld [vmem:[%s475_s1 + $0x1c] sm:$0xff]   ;;  %v388_v10 = vld [vmem:[%s475_s1 + $0x14] sm:$0xff]   ;;  %v397_v15 = vmov 0  }
   0x3   :  { %340 = vmatpush3.bf16.msra.mxu0 %v42_v3  ;;  %350 = vmatpush3.bf16.msra.mxu1 %v106_v5  ;;  %v389_v7 = vld [vmem:[%s475_s1 + $0x38] ss:$0 sps:$4 sm:$0x33]   ;;  %v387_v8 = vld [vmem:[%s475_s1] sm:$0xff]   ;;  %v391_v16 = vld [vmem:[%s475_s1 + $0x30] sm:$0xff]  }
   0x4   :  { %341 = vmatprep.subr.bf16.mxu0 %v395_v0  ;;  %351 = vmatprep.subr.bf16.mxu1 %v395_v0  ;;  %v390_v9 = vld [vmem:[%s475_s1 + $0x4c] ss:$0 sps:$4 sm:$0x33]   ;;  %v15_v11 = vld [vmem:[%s476_s0] sm:$0xf]  ;;  %v171_v13 = vsel %vm40_vm0, %v389_v7, 0 }
   0x5   :  { %v279_v12 = vld [vmem:[%s477_s2] sm:$0xff]  ;;  %v236_v14 = vsel %vm40_vm0, %v390_v9, 0  ;;  %382 = vset.pattern.permute.xlu0 %v397_v15  ;;  %v393_v18 = vld [vmem:[%s475_s1 + $0x28] sm:$0xff]  }
   0x6   :  { %282 = vperm.xlu0 %382, %v279_v12   ;;  %v392_v17 = vld [vmem:[%s475_s1 + $0x44] sm:$0xff]   ;;  %v394_v19 = vld [vmem:[%s475_s1 + $0x3c] sm:$0xff]  }
   0x7   :  { %342 = vmatpush3.bf16.msra.mxu0 %v385_v4  ;;  %352 = vmatpush3.bf16.msra.mxu1 %v386_v6 }
   0x8   :  { %343 = vmatprep.subr.bf16.mxu0 %v395_v0  ;;  %353 = vmatprep.subr.bf16.mxu1 %v395_v0 }
   0xb   :  { %344 = vmatpush3.bf16.msra.mxu0 %v387_v8  ;;  %354 = vmatpush3.bf16.msra.mxu1 %v388_v10 }
   0xc   :  { %359 = vmatprep.subr.bf16.mxu0 %v395_v0  ;;  %369 = vmatprep.subr.bf16.mxu1 %v395_v0 }
   0xe   :  { %346 = vmatmul.mubr.msk.bf16.vlgmr.msra.gmra.mxu0 %vm36_vm2, %v15_v11  ;;  %356 = vmatmul.mubr.msk.bf16.vlgmr.msra.gmra.mxu1 %vm36_vm2, %v15_v11 }
   0xf   :  { %360 = vmatpush3.bf16.msra.mxu0 %v171_v13  ;;  %370 = vmatpush3.bf16.msra.mxu1 %v236_v14 }
  0x10   :  { %361 = vmatprep.subr.bf16.mxu0 %v395_v0  ;;  %371 = vmatprep.subr.bf16.mxu1 %v395_v0 }
  0x11   :  { %365 = vmatprep.mubr.msk.bf16.mxu0 %vm396_vm1, %v395_v0  ;;  %375 = vmatprep.mubr.msk.bf16.mxu1 %vm396_vm1, %v395_v0 }
  0x13   :  { %362 = vmatpush3.bf16.msra.mxu0 %v391_v16  ;;  %372 = vmatpush3.bf16.msra.mxu1 %v392_v17 }
  0x14   :  { %363 = vmatprep.subr.bf16.mxu0 %v395_v0  ;;  %373 = vmatprep.subr.bf16.mxu1 %v395_v0 }
  0x17   :  { %364 = vmatpush3.bf16.msra.mxu0 %v393_v18  ;;  %374 = vmatpush3.bf16.msra.mxu1 %v394_v19 }
  0x1a   :  { %366 = vmatmul.mubr.msk.bf16.vlgmr.msra.gmra.mxu0 %vm36_vm2, %v15_v11  ;;  %376 = vmatmul.mubr.msk.bf16.vlgmr.msra.gmra.mxu1 %vm36_vm2, %v15_v11 }
  0x81   :  { %v283_v33 = vpop.permute.xlu0 %282 }
  0xce   :  { %v78_v20 = vpop.f32.mrf.mxu0  ;;  %v142_v21 = vpop.f32.mrf.mxu1 }
  0xcf   :  { %v148_v28 = vmax.f32 %v78_v20, %v142_v21 }
  0xd0   :  { %v347_v22 = vpop.f32.mrf.mxu0  ;;  %v357_v23 = vpop.f32.mrf.mxu1 }
  0xd2   :  { %v81_v24 = vpop.f32.mrf.mxu0  ;;  %v145_v25 = vpop.f32.mrf.mxu1 }
  0xd4   :  { %v348_v26 = vpop.f32.mrf.mxu0  ;;  %v358_v27 = vpop.f32.mrf.mxu1 }
  0xda   :  { %v207_v29 = vpop.f32.mrf.mxu0  ;;  %v272_v31 = vpop.f32.mrf.mxu1 }
  0xdb   :  { %v213_v30 = vmax.f32 %v148_v28, %v207_v29 }
  0xdc   :  { %v367_v32 = vpop.f32.mrf.mxu0  ;;  %v377_v35 = vpop.f32.mrf.mxu1 }
  0xdd   :  { %v278_v34 = vmax.f32 %v213_v30, %v272_v31 }
  0xde   :  { %v210_v36 = vpop.f32.mrf.mxu0  ;;  %v275_v38 = vpop.f32.mrf.mxu1 }
  0xdf   :  { %v285_v37 = vadd.f32 %v283_v33, %v278_v34 }
  0xe0   :  { %v368_v39 = vpop.f32.mrf.mxu0  ;;  %v378_v41 = vpop.f32.mrf.mxu1 }
  0xe1   :  { %v286_v40 = vmax.f32 %v285_v37, 0.0 }
  0xe3   :  { %287 = vst [vmem:[%s478_s3] sm:$0xff] %v286_v40 }

</bundles_post_ra>
